<compile_context>
chip_gen: v5e
topology: v5e:2x2
jax: 0.10.0
libtpu: 0.0.40
codegen_flags: <defaults>
</compile_context>

<pallas_src>
import numpy as np
import jax
import jax.numpy as jnp
from jax.experimental import pallas as pl
from jax.experimental.pallas import tpu as pltpu

_LANE = 128
_SMALL_INPUT_BYTES = 1 << 20          # below this, pallas_call overhead dominates


def _build_pe(d_model: int, max_len: int) -> jnp.ndarray:
    """Sinusoidal position encoding, identical to the PyTorch buffer (max_len, d_model)."""
    position = jnp.arange(max_len, dtype=jnp.float32)[:, None]            # (max_len, 1)
    div_term = jnp.exp(
        jnp.arange(0, d_model, 2, dtype=jnp.float32) * (-np.log(10000.0) / d_model)
    )                                                                     # (d_model//2,)
    angles = position * div_term                                          # (max_len, d_model//2)
    pe = jnp.zeros((max_len, d_model), dtype=jnp.float32)
    pe = pe.at[:, 0::2].set(jnp.sin(angles))
    pe = pe.at[:, 1::2].set(jnp.cos(angles))
    return pe


def _tpu_budget():
    """(per_buffer_bytes, vmem_limit_bytes), generation-aware with a v7x-safe default."""
    try:
        info = pltpu.get_tpu_info()
        vmem = getattr(info, "vmem_capacity_bytes", None)
        if vmem is not None and vmem >= 100 * 1024 * 1024:
            # v5e / v6e: 128 MiB physical VMEM -> bigger blocks, fewer grid steps.
            return 8 * 1024 * 1024, 64 * 1024 * 1024
    except Exception:
        pass
    # v7x (64 MiB physical / 32 MiB scoped) and unknown parts: conservative.
    return 4 * 1024 * 1024, 32 * 1024 * 1024


def _choose_tiles(B: int, N: int, itemsize: int, per_buffer_bytes: int):
    """Pick (tb, tm, tn) for the (B, M, tn) view of x (M*tn == N == D*L), or None."""
    max_elems = max(_LANE, per_buffer_bytes // itemsize)
    sublane = 8 * max(1, 4 // max(itemsize, 1))      # f32 -> 8, bf16 -> 16, int8 -> 32

    # Lane tile: 128-aligned divisors of N, at most 2048 lanes wide.
    lane_divs = [d for d in range(_LANE, min(N, 2048) + 1, _LANE) if N % d == 0]
    if not lane_divs:
        return None                                   # no lane-dense tiling exists
    # Prefer the widest tn that still leaves >= `sublane` rows (filled vregs);
    # otherwise the narrowest (maximizes row count).
    filled = [d for d in lane_divs if (N // d) >= sublane]
    tn = max(filled) if filled else min(lane_divs)
    M = N // tn

    # Row (sublane) tile: multiple of 8 (or the full extent) within the budget.
    row_budget = max(1, max_elems // tn)
    if M <= row_budget:
        tm = M
    else:
        tm = None
        hi = row_budget - (row_budget % 8)
        for cand in range(hi, 0, -8):
            if M % cand == 0:
                tm = cand
                break
        if tm is None:
            return None                               # no bounded, aligned row tile

    # Batch tile: fold batch elements while the block stays under the budget.
    batch_budget = max(1, max_elems // (tm * tn))
    tb = 1
    for cand in range(min(B, batch_budget), 0, -1):
        if B % cand == 0:
            tb = cand
            break
    return tb, tm, tn


def _ensure_multi_step(B: int, M: int, tb: int, tm: int):
    """Best-effort: guarantee >= 2 grid steps so both v7x TensorCores get work."""
    if (B // tb) * (M // tm) >= 2:
        return tb, tm
    if tb > 1:                                        # split the batch tile (free)
        for cand in range(tb // 2, 0, -1):
            if B % cand == 0:
                return cand, tm
    half = (tm // 2) - ((tm // 2) % 8)                # split rows on an 8-aligned boundary
    for cand in range(half, 0, -8):
        if M % cand == 0:
            return tb, cand
    return tb, tm                                     # tiny input: one step is fine


def _cape_kernel(x_ref, bias_ref, o_ref):
    # x_ref: (TB, TM, TN); bias_ref: (TM, TN) broadcasts across the batch dim.
    o_ref[...] = x_ref[...] + bias_ref[...]


def channel_aware_position_encoding(x, pe, channel_embed, *, force_kernel=False):
    """x: (B, d_model, L); pe: (max_len, d_model); channel_embed: (1, d_model, 1)."""
    B, D, L = x.shape
    # Pre-fuse the two broadcast operands into one (D, L) bias (tiny XLA op).
    # NOTE: bias is cast to x.dtype; for bf16 x, PyTorch type promotion with the
    # f32 pe buffer would instead give an f32 output (intentional divergence).
    bias = (pe[:L, :].T + channel_embed[0]).astype(x.dtype)               # (D, L)

    itemsize = x.dtype.itemsize
    total_bytes = B * D * L * itemsize
    if (not force_kernel) and total_bytes < _SMALL_INPUT_BYTES:
        # KiB-scale inputs: fixed pallas_call/pipeline overhead dwarfs the copy;
        # a plain add fuses for free in XLA.
        return x + bias[None]

    per_buffer_bytes, vmem_limit = _tpu_budget()
    N = D * L
    tiles = _choose_tiles(B, N, itemsize, per_buffer_bytes)
    if tiles is None:
        # Pathological shape (no 128-aligned divisor of D*L / no bounded row
        # tile): avoid oversized unaligned blocks that could blow the VMEM cap.
        return x + bias[None]
    tb, tm, tn = tiles
    M = N // tn
    tb, tm = _ensure_multi_step(B, M, tb, tm)

    # Contiguous reshapes: element (d, l) -> flat index d*L + l in both x and
    # bias, so the broadcast pairing is preserved; last dim tn is lane-dense.
    x3 = x.reshape(B, M, tn)
    bias2 = bias.reshape(M, tn)

    # VMEM budget: 2x(x block) + 2x(out block) + 2x(bias tile) <= 6*per_buffer
    # -> ~24 MiB (v7x defaults) / ~48 MiB (v5e/v6e with the raised limit).
    out = pl.pallas_call(
        _cape_kernel,
        out_shape=jax.ShapeDtypeStruct((B, M, tn), x.dtype),
        grid_spec=pltpu.PrefetchScalarGridSpec(
            num_scalar_prefetch=0,
            # m outermost, b innermost: bias block index is constant across the
            # inner batch axis, so each bias tile is DMA'd exactly once.
            grid=(M // tm, B // tb),
            in_specs=[
                pl.BlockSpec((tb, tm, tn), lambda m, b: (b, m, 0)),
                pl.BlockSpec((tm, tn), lambda m, b: (m, 0)),
            ],
            out_specs=pl.BlockSpec((tb, tm, tn), lambda m, b: (b, m, 0)),
        ),
        compiler_params=pltpu.CompilerParams(
            # Pure elementwise: both grid axes independent -> megacore / dual-TC
            # sharding on v7x.
            dimension_semantics=("parallel", "parallel"),
            vmem_limit_bytes=vmem_limit,
        ),
    )(x3, bias2)
    return out.reshape(B, D, L)


if __name__ == "__main__":
    MAX_LEN = 5000
    key = jax.random.PRNGKey(0)

    # --- Test 1: small shape from the module's forward (force the kernel path) ---
    B, D, L = 2, 32, 16
    k_x, k_ch, key = jax.random.split(key, 3)
    x = jax.random.normal(k_x, (B, D, L), dtype=jnp.float32)
    channel_embed = jax.random.normal(k_ch, (1, D, 1), dtype=jnp.float32)
    pe = _build_pe(D, MAX_LEN)

    out = channel_aware_position_encoding(x, pe, channel_embed, force_kernel=True)
    out = jax.block_until_ready(out)
    ref = x + pe[:L, :].T[None, :, :] + channel_embed
    np.testing.assert_allclose(np.asarray(out), np.asarray(ref), rtol=1e-6, atol=1e-6)

    # --- Test 2: slightly larger shape that exercises real (8, 1024) tiling ---
    B2, D2, L2 = 2, 64, 128
    k_x2, k_ch2, key = jax.random.split(key, 3)
    x2 = jax.random.normal(k_x2, (B2, D2, L2), dtype=jnp.float32)
    channel_embed2 = jax.random.normal(k_ch2, (1, D2, 1), dtype=jnp.float32)
    pe2 = _build_pe(D2, MAX_LEN)

    out2 = channel_aware_position_encoding(x2, pe2, channel_embed2, force_kernel=True)
    out2 = jax.block_until_ready(out2)
    ref2 = x2 + pe2[:L2, :].T[None, :, :] + channel_embed2
    np.testing.assert_allclose(np.asarray(out2), np.asarray(ref2), rtol=1e-6, atol=1e-6)

    # --- Test 3: default small-input fast path (no pallas_call) ---
    out3 = jax.block_until_ready(channel_aware_position_encoding(x, pe, channel_embed))
    np.testing.assert_allclose(np.asarray(out3), np.asarray(ref), rtol=1e-6, atol=1e-6)

    print("KERNEL_OK")
</pallas_src>

<mosaic_0001>
module attributes {stable_mosaic.version = 11 : i64} {
  func.func @_cape_kernel(%arg0: i32, %arg1: i32, %arg2: memref<1x4x128xf32, #tpu.memory_space<vmem>>, %arg3: memref<4x128xf32, #tpu.memory_space<vmem>>, %arg4: memref<1x4x128xf32, #tpu.memory_space<vmem>>) attributes {dimension_semantics = [#tpu.dimension_semantics<parallel>, #tpu.dimension_semantics<parallel>], iteration_bounds = array<i64: 1, 2>, scalar_prefetch = 0 : i64, scratch_operands = 0 : i64, tpu.core_type = #tpu.core_type<tc>, window_params = [{transform_indices = @transform_0, window_bounds = array<i64: 1, 4, 128>}, {transform_indices = @transform_1, window_bounds = array<i64: 4, 128>}, {transform_indices = @transform_2, window_bounds = array<i64: 1, 4, 128>}]} {
    %c0 = arith.constant 0 : index
    %c0_0 = arith.constant 0 : index
    %c0_1 = arith.constant 0 : index
    %0 = vector.load %arg2[%c0, %c0_0, %c0_1] : memref<1x4x128xf32, #tpu.memory_space<vmem>>, vector<1x4x128xf32>
    %c0_2 = arith.constant 0 : index
    %c0_3 = arith.constant 0 : index
    %1 = vector.load %arg3[%c0_2, %c0_3] : memref<4x128xf32, #tpu.memory_space<vmem>>, vector<4x128xf32>
    %2 = vector.shape_cast %1 : vector<4x128xf32> to vector<1x4x128xf32>
    %3 = arith.addf %0, %2 : vector<1x4x128xf32>
    %c0_4 = arith.constant 0 : index
    %c0_5 = arith.constant 0 : index
    %c0_6 = arith.constant 0 : index
    %4 = vector.load %arg4[%c0_4, %c0_5, %c0_6] : memref<1x4x128xf32, #tpu.memory_space<vmem>>, vector<1x4x128xf32>
    tpu.vector_store %arg4[%c0_4, %c0_5, %c0_6], %3 {strides = array<i32>} : memref<1x4x128xf32, #tpu.memory_space<vmem>>, vector<1x4x128xf32>,
    return
  }
  func.func @transform_0(%arg0: i32, %arg1: i32) -> (i32, i32, i32) {
    %c0_i32 = arith.constant 0 : i32
    %c0_i32_0 = arith.constant 0 : i32
    return %arg1, %arg0, %c0_i32 : i32, i32, i32
  }
  func.func @transform_1(%arg0: i32, %arg1: i32) -> (i32, i32) {
    %c0_i32 = arith.constant 0 : i32
    %c0_i32_0 = arith.constant 0 : i32
    return %arg0, %c0_i32 : i32, i32
  }
  func.func @transform_2(%arg0: i32, %arg1: i32) -> (i32, i32, i32) {
    %c0_i32 = arith.constant 0 : i32
    %c0_i32_0 = arith.constant 0 : i32
    return %arg1, %arg0, %c0_i32 : i32, i32, i32
  }
}

</mosaic_0001>

<bundles_post_ra>
// kernel: tpu_custom_call.1
= control target key start
LH: loop header
LB: loop body
LE: loop exit
PB: predicated region body
PF: predicated region fallthrough
CT: control target
= control target key end

     0   :  { %7 = vsyncpa [#allocation3], 0  ;;  %s714_s0 = inlined_call_operand.hbm [shape: f32[2,4,128], index: 0, kind: input, shape index: {}]   ;;  %s715_s1 = inlined_call_operand.hbm [shape: f32[4,128], index: 1, kind: input, shape index: {}]   ;;  %s716_s2 = inlined_call_operand.hbm [shape: f32[2,4,128], index: 2, kind: output, shape index: {}]  }
   0x1   :  { %9 = vsyncpa [#allocation3 + $0x1], 0 }
   0x2   :  { %10 = vsyncpa [#allocation6], 0 }
   0x3   :  { %11 = vsyncpa [#allocation4], 0 }
   0x4   :  { %13 = vsyncpa [#allocation4 + $0x1], 0  ;;  %s565_s9 = smov 0   ;;  %s567_s10 = smov 0  }
   0x5   :  { %s569_s11 = smov 0   ;;  %s571_s12 = smov 0  }
   0x6   :  { %s573_s13 = smov 0   ;;  %s575_s14 = smov 0  }
   0x7 LB: > { %s313_s15 = sadd.s32 4294967295, %s547_s14   ;;  %s314_s16 = sadd.s32 4294967294, %s547_s14   ;;  %s547_s14 = sphi %s575_s14, %s19_s14   ;;  %s543_s13 = sphi %s573_s13, %s728_s13   ;;  %s539_s12 = sphi %s571_s12, %s727_s12   ;;  %s535_s11 = sphi %s569_s11, %s726_s11   ;;  %s531_s10 = sphi %s567_s10, %s725_s10   ;;  %s527_s9 = sphi %s565_s9, %s724_s9  }
   0x8   : > { %p53_p0 = scmp.ne.s32.totalorder %s531_s10, %s527_s9  ;;  %p599_p1 = scmp.eq.s32.totalorder %s313_s15, 0 }
   0x9   : > { %p603_p2 = scmp.eq.s32.totalorder %s313_s15, 1  ;;  %p111_p3 = scmp.eq.s32.totalorder %s314_s16, 1 }
   0xa   : > { %p609_p4 = por %p599_p1, %p53_p0  ;;  %p315_p5 = scmp.ge.s32.totalorder %s547_s14, 1 }
   0xb   : > { %p614_p6 = por %p111_p3, %p53_p0  ;;  %p118_p7 = scmp.lt.s32.totalorder %s547_s14, 3 }
   0xc   : > { %s132_s23 = sshll.u32 %s715_s1, 4  ;;  %p317_p9 = scmp.ge.s32.totalorder %s547_s14, 2  ;;  %s133_s23 = int_to_ptr.hbm [resolvable:$true] %s132_s23 }
   0xd   : > { %p622_p8 = pnand %p315_p5, %p118_p7  ;;  %s549_s25 = smov [#allocation5]  }
   0xe   : > { %s134_s26 = sshll.u32 %s549_s25, 4  ;;  %s28_s27 = sadd.s32 1, %s543_s13  ;;  %s135_s26 = int_to_ptr.vmem [resolvable:$true] %s134_s26 }
   0xf   : > { %p336_p10 = pneg %p622_p8  ;;  %p29_p12 = scmp.ge.s32.totalorder %s28_s27, 2 }
  0x10   : > { %s40_s28 = sadd.s32 1, %s535_s11  ;;  %p47_p13 = scmp.ne.s32.totalorder %s535_s11, %s531_s10 }
  0x11   : > { %p337_p11 = pnand %p336_p10, %p599_p1  ;;  %p48_p0 = scmp.eq.s32.totalorder %s547_s14, 0 }
  0x12   : > { %s730_s27 = smov (%p29_p12, %s28_s27), 0  ;;  %p644_p5 = por %p603_p2, %p47_p13 }
  0x13   : > { %339 = dma.hbm_to_vmem [thread:$0]  (!%p337_p11), %s133_s23, 64, %s135_s26, [#allocation6]  }
  0x14   : > { %p638_p3 = por %p48_p0, %p47_p13  ;;  %s35_s3 = ssub.s32 %s543_s13, %s730_s27 }
  0x15   : > { %p349_p7 = scmp.lt.s32.totalorder %s547_s14, 2  ;;  %p38_p10 = scmp.eq.s32.totalorder %s35_s3, 0 }
  0x16   : > { %s145_s4 = sand.u32 1, %s535_s11   ;;  %s319_s7 = sshll.u32 %s543_s13, 2 }
  0x17   : > { %s318_s5 = sshll.u32 %s145_s4, 2  ;;  %s154_s16 = scalar_lea.hbm %s714_s0, %s319_s7 }
  0x18   : > { %s653_s6 = scalar_select %p38_p10, %s535_s11, %s40_s28  }
  0x19   : > { %s149_s21 = scalar_lea.vmem [#allocation2], %s318_s5  ;;  %s156_s18 = sshll.u32 %s154_s16, 4  ;;  %s157_s18 = int_to_ptr.hbm [resolvable:$true] %s156_s18 }
  0x1a   : > { %s158_s22 = sshll.u32 %s149_s21, 4  ;;  %p341_p2 = pnand %p349_p7, %p638_p3  ;;  %s159_s22 = int_to_ptr.vmem [resolvable:$true] %s158_s22 }
  0x1b   : > { %s146_s23 = scalar_lea.sflag [#allocation3], %s145_s4  ;;  %167 = sbr.rel (%p622_p8) target bundleno = 50 (0x32), region = 28 }
  0x1c   : > { %343 = dma.hbm_to_vmem [thread:$0]  (!%p341_p2), %s157_s18, 64, %s159_s22, %s146_s23  }
  0x1d   : > { %s664_s25 = sand.u32 (!%p622_p8), 1, %s531_s10  }
  0x1e   : > { %s321_s26 = sshll.u32 (!%p622_p8), %s664_s25, 2  ;;  %s170_s28 = scalar_lea.sflag (!%p622_p8), [#allocation3], %s664_s25 }
  0x1f   : > { %s173_s3 = scalar_lea.vmem (!%p622_p8), [#allocation2], %s321_s26 }
  0x20   : > { %514 = dma.done.wait (%p609_p4), %s170_s28, 64  }
  0x21   : > { %516 = vsyncadd (%p609_p4), %s170_s28, 4294967232 }
  0x22   : > { %518 = dma.done.wait (%p599_p1), [#allocation6], 64  }
  0x23   : > { %520 = vsyncadd (%p599_p1), [#allocation6], 4294967232  ;;  %s325_s24 = sshll.u32 %s539_s12, 2  ;;  %s199_s7 = scalar_lea.vmem [#allocation7], %s321_s26  ;;  %v200_v0 = vld [vmem:[%s173_s3] sm:$0xf] }
  0x24   : > { %s216_s5 = scalar_lea.hbm %s716_s2, %s325_s24  ;;  %s218_s8 = sshll.u32 %s199_s7, 4  ;;  %v201_v1 = vld [vmem:[#allocation5] sm:$0xf]  ;;  %s219_s8 = int_to_ptr.vmem [resolvable:$true] %s218_s8 }
  0x25   : > { %s220_s15 = sshll.u32 %s216_s5, 4  ;;  %v202_v2 = vadd.f32 %v201_v1, %v200_v0  ;;  %s205_s19 = scalar_lea.sflag [#allocation4], %s664_s25  ;;  %s221_s15 = int_to_ptr.hbm [resolvable:$true] %s220_s15 }
  0x26   : > { %s475_s17 = sshra.s32 %s221_s15, 4  ;;  %s481_s22 = scalar_lea.hbm %s716_s2, 8  ;;  %s476_s17 = int_to_ptr.hbm [resolvable:$true] %s475_s17 }
  0x27   : > { %203 = vst [vmem:[%s199_s7] sm:$0xf] %v202_v2  ;;  %s477_s16 = scalar_lea.hbm %s476_s17, 4  ;;  %p482_p11 = scmp.lt.s32.totalorder %s476_s17, %s716_s2 }
  0x28   : > { %p478_p1 = scmp.ne.s32.totalorder %s476_s17, %s477_s16  ;;  %p483_p12 = scmp.lt.s32.totalorder %s481_s22, %s477_s16 }
  0x2a   : > { %p479_p4 = pnand %p478_p1, %p644_p5  ;;  %p484_p13 = por %p483_p12, %p482_p11 }
  0x2c   : > { %p480_p8 = pneg %p479_p4 }
  0x2e   : > { %p485_p0 = pnand %p484_p13, %p480_p8 }
  0x30   : > { %488 = shalt.err (!%p485_p0)
}
  0x31   : > { %334 = dma.vmem_to_hbm [thread:$0]  (%p644_p5), %s219_s8, 64, %s221_s15, %s205_s19  }
  0x32 PF: > { %s232_s25 = sand.u32 1, %s527_s9   ;;  %p345_p3 = pnand %p317_p9, %p614_p6 }
  0x33   : > { %s233_s26 = scalar_lea.sflag [#allocation4], %s232_s25 }
  0x34   : > { %p346_p7 = pneg %p345_p3 }
  0x36   : > { %522 = dma.done.wait (%p346_p7), %s233_s26, 64  }
  0x37   : > { %524 = vsyncadd (%p346_p7), %s233_s26, 4294967232  ;;  %s19_s14 = sadd.s32 1, %s547_s14   ;;  %s724_s9 = smov %s531_s10 }
  0x38   : > { %p16_p10 = scmp.ge.s32.totalorder %s19_s14, 4   ;;  %s725_s10 = smov %s535_s11 }
  0x39   : > { %s726_s11 = smov %s653_s6  ;;  %s727_s12 = smov %s543_s13 }
  0x3a   : > { %s728_s13 = smov %s730_s27  ;;  %18 = sbr.rel (!%p16_p10) target bundleno = 7 (0x7), region = 78 }
  0x3f   :  { %239 = vsyncpa [#allocation3], 1 }
  0x40   :  { %241 = vsyncpa [#allocation3 + $0x1], 1 }
  0x41   :  { %242 = vsyncpa [#allocation6], 1 }
  0x42   :  { %243 = vsyncpa [#allocation4], 1 }
  0x43   :  { %245 = vsyncpa [#allocation4 + $0x1], 1 }

</bundles_post_ra>
